<compile_context>
chip_gen: v6e
topology: v6e:2x2x1
jax: 0.10.0
libtpu: 0.0.40
codegen_flags: <defaults>
</compile_context>

<pallas_src>
import jax
import jax.numpy as jnp
from jax.experimental import pallas as pl
from jax.experimental.pallas import tpu as pltpu

_MIB = 1024 * 1024


# ----------------------------------------------------------------------------
# Kernels
# ----------------------------------------------------------------------------
def _copy_kernel(x_ref, o_ref):
    # Straight copy of the current tile — the entire forward pass.
    o_ref[...] = x_ref[...]


def _dma_copy_kernel(x_hbm, o_hbm, sem):
    # Single HBM->HBM DMA: no VMEM staging, no per-tile step overhead.
    cp = pltpu.make_async_copy(x_hbm, o_hbm, sem)
    cp.start()
    cp.wait()


# ----------------------------------------------------------------------------
# Hardware-aware sizing helpers
# ----------------------------------------------------------------------------
def _tpu_vmem_and_cores():
    """(per-core VMEM bytes, TensorCores per chip) with safe fallbacks."""
    vmem = 128 * _MIB
    try:
        info = pltpu.get_tpu_info()
        vmem = int(getattr(info, "vmem_capacity_bytes", vmem)) or vmem
    except Exception:
        pass
    # v7x: 64 MiB per TC, 2 TCs/chip.  v5e/v6e: 128 MiB, single TC.
    num_cores = 2 if vmem <= 64 * _MIB else 1
    return vmem, num_cores


def _sublane_pack(dtype) -> int:
    # Rows per packed sublane group: f32 -> 8, bf16/f16 -> 16, int8/fp8 -> 32.
    return max(8, 32 // jnp.dtype(dtype).itemsize)


def _pick_tile_m(M, N, dtype, per_tile_budget_bytes, num_cores):
    """Largest row-tile that (a) respects dtype sublane packing, (b) keeps the
    double-buffered in+out footprint (4 * tile_bytes) within budget, and
    (c) splits 2-way only when the chip actually has 2 TensorCores."""
    itemsize = jnp.dtype(dtype).itemsize
    pack = _sublane_pack(dtype)
    rows_by_vmem = max(pack, per_tile_budget_bytes // max(1, N * itemsize))
    tile_m = min(M, rows_by_vmem)
    if tile_m < M:
        # Round down to the packing multiple -> full, unmasked stores.
        tile_m = max(pack, (tile_m // pack) * pack)
    elif num_cores >= 2 and M >= 2 * pack:
        # One block would cover all rows; split so both v7x TCs can stream.
        half = -(-M // 2)                          # ceil(M / 2)
        tile_m = min(M, -(-half // pack) * pack)   # round up to packing multiple
    return tile_m


def _lane_dense_2d(x):
    """2-D view with a lane-dense last dim.  Narrow or non-multiple-of-128
    last dims are flattened and re-blocked to a wide multiple of 128 so the
    output stores are full unmasked `vst` (biggest measured lever for ragged
    widths); otherwise leading dims are simply flattened."""
    total = x.size
    last = x.shape[-1] if x.ndim >= 1 else total
    if x.ndim >= 2 and last % 128 == 0 and last >= 256:
        return x.reshape(-1, last)
    for width in (8192, 4096, 2048, 1024, 512, 256, 128):
        if total % width == 0:
            return x.reshape(total // width, width)
    return x.reshape(1, total) if x.ndim <= 1 else x.reshape(-1, last)


# ----------------------------------------------------------------------------
# Pallas copy paths
# ----------------------------------------------------------------------------
def _pallas_copy_tiled(x2, *, alias_input, vmem_limit_bytes,
                       per_tile_budget_bytes, num_cores, tile_m=None):
    M, N = x2.shape
    itemsize = jnp.dtype(x2.dtype).itemsize
    if tile_m is None:
        tile_m = _pick_tile_m(M, N, x2.dtype, per_tile_budget_bytes, num_cores)
    tile_m = min(tile_m, M)
    grid = (pl.cdiv(M, tile_m),)
    return pl.pallas_call(
        _copy_kernel,
        out_shape=jax.ShapeDtypeStruct((M, N), x2.dtype),
        grid=grid,
        # Full N as the (lane-dense) block width; full-dim blocks are exempt
        # from the 128-divisibility rule for any N.
        in_specs=[pl.BlockSpec((tile_m, N), lambda i: (i, 0))],
        out_specs=pl.BlockSpec((tile_m, N), lambda i: (i, 0)),
        compiler_params=pltpu.CompilerParams(
            dimension_semantics=("parallel",),
            vmem_limit_bytes=vmem_limit_bytes,
        ),
        cost_estimate=pl.CostEstimate(
            flops=0, transcendentals=0, bytes_accessed=2 * M * N * itemsize),
        input_output_aliases=({0: 0} if alias_input else {}),
    )(x2)


def _pallas_copy_dma(x2):
    M, N = x2.shape
    itemsize = jnp.dtype(x2.dtype).itemsize
    return pl.pallas_call(
        _dma_copy_kernel,
        out_shape=jax.ShapeDtypeStruct((M, N), x2.dtype),
        in_specs=[pl.BlockSpec(memory_space=pl.ANY)],
        out_specs=pl.BlockSpec(memory_space=pl.ANY),
        scratch_shapes=[pltpu.SemaphoreType.DMA],
        cost_estimate=pl.CostEstimate(
            flops=0, transcendentals=0, bytes_accessed=2 * M * N * itemsize),
    )(x2)


# ----------------------------------------------------------------------------
# Forward pass (IdentitySAE)
# ----------------------------------------------------------------------------
def identity_sae_forward(x, output_features=False, *, use_copy_kernel=False,
                         copy_method="tiled", alias_input=False, tile_m=None):
    """IdentitySAE.forward.

    Default (`use_copy_kernel=False`): no kernel launch and no data movement —
    returning x is exactly the PyTorch identity semantics.

    `use_copy_kernel=True` runs an explicit Pallas copy (benchmark path):
      * copy_method="tiled": lane-dense BlockSpec pipeline, tile budget sized
        from the chip's VMEM, 2-way split only on 2-TC chips (v7x).
      * copy_method="dma":   one HBM->HBM DMA, no VMEM staging at all.
    `alias_input=True` aliases the tiled copy's output onto the input buffer
    (a true no-op when x is donated at the jit boundary).
    """
    if not use_copy_kernel:
        return (x, x) if output_features else x

    orig_shape = x.shape
    x2 = _lane_dense_2d(x)
    vmem_cap, num_cores = _tpu_vmem_and_cores()
    vmem_limit = min(int(0.75 * vmem_cap), 96 * _MIB)   # ~48 MiB v7x, 96 MiB v5e/v6e
    per_tile_budget = max(8 * _MIB, vmem_limit // 4)    # 4*tile (in+out, 2x buffered)

    if copy_method == "dma":
        out = _pallas_copy_dma(x2)
    else:
        out = _pallas_copy_tiled(
            x2, alias_input=alias_input, vmem_limit_bytes=vmem_limit,
            per_tile_budget_bytes=per_tile_budget, num_cores=num_cores,
            tile_m=tile_m)

    out = out.reshape(orig_shape)
    if output_features:
        # encode(x) == x, so the features are literally the same array.
        return out, out
    return out


if __name__ == "__main__":
    # IdentitySAE has no parameters (activation_dim only records the size).
    key = jax.random.PRNGKey(0)
    batch, activation_dim = 32, 256
    x = jax.random.normal(key, (batch, activation_dim), dtype=jnp.float32)

    # 1) Default fast path: pure identity, no kernel, no HBM traffic.
    y = jax.block_until_ready(identity_sae_forward(x))
    assert y.shape == x.shape and y.dtype == x.dtype
    assert jnp.array_equal(y, x)
    y2, feats = identity_sae_forward(x, output_features=True)
    jax.block_until_ready((y2, feats))
    assert jnp.array_equal(y2, x) and jnp.array_equal(feats, x)

    # 2) Explicit tiled Pallas copy (benchmark path).
    yk = jax.block_until_ready(identity_sae_forward(x, use_copy_kernel=True))
    assert yk.shape == x.shape and yk.dtype == x.dtype
    assert jnp.array_equal(yk, x)

    # 3) Single HBM->HBM DMA copy (no VMEM staging).
    yd = jax.block_until_ready(
        identity_sae_forward(x, use_copy_kernel=True, copy_method="dma"))
    assert jnp.array_equal(yd, x)

    # 4) bf16 with a non-multiple-of-128 width: exercises the lane-dense
    #    re-blocking (48*200 = 9600 -> (75, 128)) and packing-aware tile_m.
    xb = jax.random.normal(jax.random.PRNGKey(0), (48, 200)).astype(jnp.bfloat16)
    yb = jax.block_until_ready(identity_sae_forward(xb, use_copy_kernel=True))
    assert yb.shape == xb.shape and yb.dtype == xb.dtype
    assert jnp.array_equal(yb, xb)

    print("KERNEL_OK")
</pallas_src>

<mosaic_0001>
module attributes {stable_mosaic.version = 11 : i64} {
  func.func @_copy_kernel(%arg0: i32, %arg1: memref<32x256xf32, #tpu.memory_space<vmem>>, %arg2: memref<32x256xf32, #tpu.memory_space<vmem>>) attributes {dimension_semantics = [#tpu.dimension_semantics<parallel>], iteration_bounds = array<i64: 1>, scalar_prefetch = 0 : i64, scratch_operands = 0 : i64, tpu.core_type = #tpu.core_type<tc>, window_params = [{transform_indices = @transform_0, window_bounds = array<i64: 32, 256>}, {transform_indices = @transform_1, window_bounds = array<i64: 32, 256>}]} {
    %c0 = arith.constant 0 : index
    %c0_0 = arith.constant 0 : index
    %0 = vector.load %arg1[%c0, %c0_0] : memref<32x256xf32, #tpu.memory_space<vmem>>, vector<32x256xf32>
    %c0_1 = arith.constant 0 : index
    %c0_2 = arith.constant 0 : index
    %1 = vector.load %arg2[%c0_1, %c0_2] : memref<32x256xf32, #tpu.memory_space<vmem>>, vector<32x256xf32>
    tpu.vector_store %arg2[%c0_1, %c0_2], %0 {strides = array<i32>} : memref<32x256xf32, #tpu.memory_space<vmem>>, vector<32x256xf32>,
    return
  }
  func.func @transform_0(%arg0: i32) -> (i32, i32) {
    %c0_i32 = arith.constant 0 : i32
    %c0_i32_0 = arith.constant 0 : i32
    return %arg0, %c0_i32 : i32, i32
  }
  func.func @transform_1(%arg0: i32) -> (i32, i32) {
    %c0_i32 = arith.constant 0 : i32
    %c0_i32_0 = arith.constant 0 : i32
    return %arg0, %c0_i32 : i32, i32
  }
}

</mosaic_0001>

<bundles_post_ra>
// kernel: tpu_custom_call.1
= control target key start
LH: loop header
LB: loop body
LE: loop exit
PB: predicated region body
PF: predicated region fallthrough
CT: control target
= control target key end

     0   :  { %6 = vsyncpa [#allocation3], 0  ;;  %s130_s0 = inlined_call_operand.hbm [shape: f32[32,256], index: 0, kind: input, shape index: {}]   ;;  %s131_s1 = inlined_call_operand.hbm [shape: f32[32,256], index: 1, kind: output, shape index: {}]  }
   0x1   :  { %7 = vsyncpa [#allocation4], 0  ;;  %s104_s6 = smov [#allocation2]  }
   0x2   :  { %s13_s7 = sshll.u32 %s104_s6, 4  ;;  %s14_s7 = int_to_ptr.vmem [resolvable:$true] %s13_s7 }
   0x3   :  { %s68_s8 = scalar_lea.vmem %s14_s7, 1024  ;;  %p73_p1 = scmp.lt.s32.totalorder %s14_s7, %s14_s7 }
   0x4   :  { %p69_p0 = scmp.ne.s32.totalorder %s14_s7, %s68_s8  ;;  %p74_p2 = scmp.lt.s32.totalorder %s68_s8, %s68_s8 }
   0x6   :  { %p75_p3 = por %p74_p2, %p73_p1 }
   0x8   :  { %p76_p4 = pnand %p75_p3, %p69_p0 }
   0xa   :  { %79 = shalt.err (!%p76_p4)
}
   0xb   :  { %s105_s9 = smov 256   ;;  %s106_s10 = smov 16  }
   0xc   :  { %19 = dma.hbm_to_vmem [thread:$0]  %s130_s0, 1024, %s14_s7, [#allocation3], %s105_s9, %s105_s9, %s106_s10  }
   0xd   :  { %100 = dma.done.wait [#allocation3], 1024  }
   0xe   :  { %101 = vsyncadd [#allocation3], 4294966272  ;;  %s107_s13 = smov [#allocation5]   ;;  %v23_v0 = vld [vmem:[#allocation2] sm:$0xff]  ;;  %v24_v1 = vld [vmem:[#allocation2 + $0x8] sm:$0xff] }
   0xf   :  { %s44_s14 = sshll.u32 %s107_s13, 4  ;;  %v25_v2 = vld [vmem:[#allocation2 + $0x10] sm:$0xff]  ;;  %31 = vst [vmem:[#allocation5] sm:$0xff] %v23_v0  ;;  %32 = vst [vmem:[#allocation5 + $0x8] sm:$0xff] %v24_v1  ;;  %v26_v3 = vld [vmem:[#allocation2 + $0x18] sm:$0xff]  ;;  %s45_s14 = int_to_ptr.vmem [resolvable:$true] %s44_s14 }
  0x10   :  { %33 = vst [vmem:[#allocation5 + $0x10] sm:$0xff] %v25_v2  ;;  %v27_v4 = vld [vmem:[#allocation2 + $0x20] sm:$0xff]  ;;  %v28_v5 = vld [vmem:[#allocation2 + $0x28] sm:$0xff]  ;;  %34 = vst [vmem:[#allocation5 + $0x18] sm:$0xff] %v26_v3  ;;  %s80_s0 = scalar_lea.vmem %s45_s14, 1024  ;;  %p85_p6 = scmp.lt.s32.totalorder %s45_s14, %s45_s14 }
  0x11   :  { %35 = vst [vmem:[#allocation5 + $0x20] sm:$0xff] %v27_v4  ;;  %36 = vst [vmem:[#allocation5 + $0x28] sm:$0xff] %v28_v5  ;;  %v29_v6 = vld [vmem:[#allocation2 + $0x30] sm:$0xff]  ;;  %v30_v7 = vld [vmem:[#allocation2 + $0x38] sm:$0xff]  ;;  %p81_p5 = scmp.ne.s32.totalorder %s45_s14, %s80_s0  ;;  %p86_p7 = scmp.lt.s32.totalorder %s80_s0, %s80_s0 }
  0x12   :  { %37 = vst [vmem:[#allocation5 + $0x30] sm:$0xff] %v29_v6  ;;  %38 = vst [vmem:[#allocation5 + $0x38] sm:$0xff] %v30_v7 }
  0x13   :  { %p87_p8 = por %p86_p7, %p85_p6 }
  0x15   :  { %p88_p9 = pnand %p87_p8, %p81_p5 }
  0x17   :  { %91 = shalt.err (!%p88_p9)
}
  0x18   :  { %50 = dma.vmem_to_hbm [thread:$0]  %s45_s14, 1024, %s131_s1, [#allocation4], %s105_s9, %s105_s9, %s106_s10  }
  0x19   :  { %102 = dma.done.wait [#allocation4], 1024  }
  0x1a   :  { %103 = vsyncadd [#allocation4], 4294966272 }
  0x1b   :  { %54 = vsyncpa [#allocation3], 1 }
  0x1c   :  { %55 = vsyncpa [#allocation4], 1 }

</bundles_post_ra>
